<compile_context>
chip_gen: v7x
topology: tpu7x:2x2x1
jax: 0.10.0
libtpu: 0.0.40
codegen_flags: <defaults>
</compile_context>

<pallas_src>
import functools

import jax
import jax.numpy as jnp
from jax.experimental import pallas as pl
from jax.experimental.pallas import tpu as pltpu


# ---------------------------------------------------------------------------
# Helpers.
# ---------------------------------------------------------------------------
def _max_neutral(dtype):
    """dtype-matched neutral element for a running max."""
    if jnp.issubdtype(dtype, jnp.floating):
        return jnp.asarray(-jnp.inf, dtype)
    return jnp.asarray(jnp.iinfo(dtype).min, dtype)


def _pick_batch_tile(B):
    # Output / accumulator block (TB, C): TB must be divisible by 8 or equal B.
    if B <= 8:
        return B
    if B % 8 == 0:
        return 8
    return B  # full-extent block is always legal


def _target_block_bytes():
    # ~6-8 MiB input blocks amortize the ~0.35 us per-grid-step overhead
    # (>=~95% of HBM roofline on v6e, ~88% on v7x) while 2x blocks
    # (double-buffer) + accumulators stay under the 32 MiB scoped limit below.
    try:
        vmem = pltpu.get_tpu_info().vmem_capacity_bytes
    except Exception:  # fallback if hardware query is unavailable
        vmem = 128 * 1024 * 1024
    return 8 * 1024 * 1024 if vmem >= 96 * 1024 * 1024 else 6 * 1024 * 1024


def _pick_hw_tile(HW, TB, C, itemsize, target_bytes):
    # Lanes a multiple of 128 (or the full HW extent).
    per_lane = max(TB * C * itemsize, 1)
    t = max(128, (target_bytes // per_lane) // 128 * 128)
    if t >= HW:
        return HW
    return t


# ---------------------------------------------------------------------------
# Fused kernel: streaming sum/max pooling + fc + sigmoid.
# ---------------------------------------------------------------------------
def _fused_kernel(x_ref, w1t_ref, w2t_ref, o_ref, sum_scr, max_scr,
                  *, thw, hw, need_mask, inv_hw):
    # x_ref   : (TB, C, THW) current tile, native dtype
    # w1t_ref : (C, Cr)  = W1^T   (constant block, DMA'd once, resident)
    # w2t_ref : (Cr, C)  = W2^T
    # o_ref   : (TB, C)  sigmoid attention weights (lane-dense, C on lanes)
    # sum_scr : (TB, C) f32 running spatial sum   (VMEM scratch)
    # max_scr : (TB, C) f32 running spatial max
    k = pl.program_id(1)
    n_k = pl.num_programs(1)
    x = x_ref[...]  # keep native dtype in vregs (no whole-tile upcast)

    def accumulate(psum, pmax):
        # On k == 0 store directly; otherwise accumulate (saves an RMW).
        @pl.when(k == 0)
        def _():
            sum_scr[...] = psum
            max_scr[...] = pmax

        @pl.when(k != 0)
        def _():
            sum_scr[...] = sum_scr[...] + psum
            max_scr[...] = jnp.maximum(max_scr[...], pmax)

    def reduce_unmasked():
        psum = jnp.sum(x, axis=-1, dtype=jnp.float32)    # (TB, C)
        pmax = jnp.max(x, axis=-1).astype(jnp.float32)   # (TB, C)
        accumulate(psum, pmax)

    if need_mask:
        # THW is a multiple of 128, so only the last hw step can be ragged:
        # keep the hot (non-last) path completely mask-free.
        is_last = k == n_k - 1

        @pl.when(jnp.logical_not(is_last))
        def _():
            reduce_unmasked()

        @pl.when(is_last)
        def _():
            lane = jax.lax.broadcasted_iota(jnp.int32, x.shape, dimension=2)
            valid = (k * thw + lane) < hw
            x_sum = jnp.where(valid, x, jnp.asarray(0, x.dtype))
            x_max = jnp.where(valid, x, _max_neutral(x.dtype))
            psum = jnp.sum(x_sum, axis=-1, dtype=jnp.float32)
            pmax = jnp.max(x_max, axis=-1).astype(jnp.float32)
            accumulate(psum, pmax)
    else:
        reduce_unmasked()

    # Fused epilogue on the final hw step of this batch tile:
    #   fc(avg) + fc(max) = (relu(avg @ W1^T) + relu(max @ W1^T)) @ W2^T
    @pl.when(k == n_k - 1)
    def _():
        avg = sum_scr[...] * inv_hw          # (TB, C) spatial mean (f32)
        mx = max_scr[...]                    # (TB, C)
        w1t = w1t_ref[...]                   # (C, Cr)
        w2t = w2t_ref[...]                   # (Cr, C)
        h = (jnp.maximum(jnp.dot(avg, w1t, preferred_element_type=jnp.float32), 0.0)
             + jnp.maximum(jnp.dot(mx, w1t, preferred_element_type=jnp.float32), 0.0))
        y = jnp.dot(h, w2t, preferred_element_type=jnp.float32)   # (TB, C)
        o_ref[...] = jax.nn.sigmoid(y).astype(o_ref.dtype)


# ---------------------------------------------------------------------------
# Wrapper.
# ---------------------------------------------------------------------------
def channel_attention(x_nchw, w1, w2):
    """x_nchw: (B, C, H, W); w1: (C//r, C); w2: (C, C//r). Returns (B, C, 1, 1)."""
    B, C, H, W = x_nchw.shape
    HW = H * W
    Cr = w1.shape[0]
    x_flat = x_nchw.reshape(B, C, HW)

    TB = _pick_batch_tile(B)
    THW = _pick_hw_tile(HW, TB, C, x_nchw.dtype.itemsize, _target_block_bytes())
    n_b = B // TB
    n_k = pl.cdiv(HW, THW)
    need_mask = (HW % THW) != 0

    # Trace-time transposes in the wrapper so the kernel feeds the MXU directly.
    w1t = jnp.transpose(w1)  # (C, Cr)
    w2t = jnp.transpose(w2)  # (Cr, C)

    att = pl.pallas_call(
        functools.partial(_fused_kernel, thw=THW, hw=HW,
                          need_mask=need_mask, inv_hw=1.0 / HW),
        out_shape=jax.ShapeDtypeStruct((B, C), x_nchw.dtype),
        grid_spec=pltpu.PrefetchScalarGridSpec(
            num_scalar_prefetch=0,
            grid=(n_b, n_k),
            in_specs=[
                pl.BlockSpec((TB, C, THW), lambda b, k: (b, 0, k)),
                pl.BlockSpec((C, Cr), lambda b, k: (0, 0)),   # resident W1^T
                pl.BlockSpec((Cr, C), lambda b, k: (0, 0)),   # resident W2^T
            ],
            out_specs=pl.BlockSpec((TB, C), lambda b, k: (b, 0)),
            scratch_shapes=[
                pltpu.VMEM((TB, C), jnp.float32),   # running spatial sum
                pltpu.VMEM((TB, C), jnp.float32),   # running spatial max
            ],
        ),
        compiler_params=pltpu.CompilerParams(
            dimension_semantics=("parallel", "arbitrary"),
            vmem_limit_bytes=32 * 1024 * 1024,
        ),
    )(x_flat, w1t, w2t)

    return att.reshape(B, C, 1, 1)


# ---------------------------------------------------------------------------
# Pure-JAX reference mirroring the PyTorch forward.
# ---------------------------------------------------------------------------
def reference_channel_attention(x_nchw, w1, w2):
    xf = x_nchw.astype(jnp.float32)
    avg = jnp.mean(xf, axis=(2, 3))                          # (B, C)
    mx = jnp.max(xf, axis=(2, 3))                            # (B, C)

    def fc(v):  # v: (B, C)
        h = jnp.maximum(v @ w1.T.astype(jnp.float32), 0.0)   # (B, Cr)
        return h @ w2.T.astype(jnp.float32)                  # (B, C)

    out = jax.nn.sigmoid(fc(avg) + fc(mx))                   # (B, C)
    return out[:, :, None, None].astype(x_nchw.dtype)


if __name__ == "__main__":
    B, C, H, W = 2, 8, 16, 16
    reduction = 4
    Cr = C // reduction

    key = jax.random.PRNGKey(0)
    kx, k1, k2 = jax.random.split(key, 3)

    x = jax.random.normal(kx, (B, C, H, W), dtype=jnp.float32)
    # Deterministic synthetic weights for the two bias-free 1x1 convs.
    w1 = jax.random.normal(k1, (Cr, C), dtype=jnp.float32) * (1.0 / jnp.sqrt(C))
    w2 = jax.random.normal(k2, (C, Cr), dtype=jnp.float32) * (1.0 / jnp.sqrt(Cr))

    y = channel_attention(x, w1, w2)
    y = jax.block_until_ready(y)

    y_ref = reference_channel_attention(x, w1, w2)
    assert y.shape == (B, C, 1, 1)
    assert jnp.allclose(y, y_ref, atol=1e-5, rtol=1e-5), (
        f"max abs err = {jnp.max(jnp.abs(y - y_ref))}"
    )

    print("KERNEL_OK")
</pallas_src>

<mosaic_0001>
module attributes {stable_mosaic.version = 11 : i64} {
  func.func @_fused_kernel(%arg0: i32, %arg1: i32, %arg2: memref<2x8x256xf32, #tpu.memory_space<vmem>>, %arg3: memref<8x2xf32, #tpu.memory_space<vmem>>, %arg4: memref<2x8xf32, #tpu.memory_space<vmem>>, %arg5: memref<2x8xf32, #tpu.memory_space<vmem>>, %arg6: memref<2x8xf32, #tpu.memory_space<vmem>>, %arg7: memref<2x8xf32, #tpu.memory_space<vmem>>) attributes {dimension_semantics = [#tpu.dimension_semantics<parallel>, #tpu.dimension_semantics<arbitrary>], iteration_bounds = array<i64: 1, 1>, scalar_prefetch = 0 : i64, scratch_operands = 2 : i64, tpu.core_type = #tpu.core_type<tc>, window_params = [{transform_indices = @transform_0, window_bounds = array<i64: 2, 8, 256>}, {pipeline_mode = #tpu.pipeline_mode<synchronous>, transform_indices = @transform_1, window_bounds = array<i64: 8, 2>}, {pipeline_mode = #tpu.pipeline_mode<synchronous>, transform_indices = @transform_2, window_bounds = array<i64: 2, 8>}, {transform_indices = @transform_3, window_bounds = array<i64: 2, 8>}]} {
    %c0 = arith.constant 0 : index
    %c0_0 = arith.constant 0 : index
    %c0_1 = arith.constant 0 : index
    %0 = vector.load %arg2[%c0, %c0_0, %c0_1] : memref<2x8x256xf32, #tpu.memory_space<vmem>>, vector<2x8x256xf32>
    %cst = arith.constant dense<0.000000e+00> : vector<2x8xf32>
    %1 = vector.multi_reduction <add>, %0, %cst [2] : vector<2x8x256xf32> to vector<2x8xf32>
    %cst_2 = arith.constant dense<0xFF800000> : vector<2x8xf32>
    %2 = vector.multi_reduction <maximumf>, %0, %cst_2 [2] : vector<2x8x256xf32> to vector<2x8xf32>
    %c0_i32 = arith.constant 0 : i32
    %3 = arith.cmpi eq, %arg1, %c0_i32 : i32
    %4 = arith.extui %3 : i1 to i32
    %c0_i32_3 = arith.constant 0 : i32
    %5 = arith.cmpi ne, %4, %c0_i32_3 : i32
    scf.if %5 {
      %c0_8 = arith.constant 0 : index
      %c0_9 = arith.constant 0 : index
      %12 = vector.load %arg6[%c0_8, %c0_9] : memref<2x8xf32, #tpu.memory_space<vmem>>, vector<2x8xf32>
      tpu.vector_store %arg6[%c0_8, %c0_9], %1 {strides = array<i32>} : memref<2x8xf32, #tpu.memory_space<vmem>>, vector<2x8xf32>,
      %c0_10 = arith.constant 0 : index
      %c0_11 = arith.constant 0 : index
      %13 = vector.load %arg7[%c0_10, %c0_11] : memref<2x8xf32, #tpu.memory_space<vmem>>, vector<2x8xf32>
      tpu.vector_store %arg7[%c0_10, %c0_11], %2 {strides = array<i32>} : memref<2x8xf32, #tpu.memory_space<vmem>>, vector<2x8xf32>,
    } else {
    }
    %c0_i32_4 = arith.constant 0 : i32
    %6 = arith.cmpi ne, %arg1, %c0_i32_4 : i32
    %7 = arith.extui %6 : i1 to i32
    %c0_i32_5 = arith.constant 0 : i32
    %8 = arith.cmpi ne, %7, %c0_i32_5 : i32
    scf.if %8 {
      %c0_8 = arith.constant 0 : index
      %c0_9 = arith.constant 0 : index
      %12 = vector.load %arg6[%c0_8, %c0_9] : memref<2x8xf32, #tpu.memory_space<vmem>>, vector<2x8xf32>
      %13 = arith.addf %12, %1 : vector<2x8xf32>
      %c0_10 = arith.constant 0 : index
      %c0_11 = arith.constant 0 : index
      %14 = vector.load %arg6[%c0_10, %c0_11] : memref<2x8xf32, #tpu.memory_space<vmem>>, vector<2x8xf32>
      tpu.vector_store %arg6[%c0_10, %c0_11], %13 {strides = array<i32>} : memref<2x8xf32, #tpu.memory_space<vmem>>, vector<2x8xf32>,
      %c0_12 = arith.constant 0 : index
      %c0_13 = arith.constant 0 : index
      %15 = vector.load %arg7[%c0_12, %c0_13] : memref<2x8xf32, #tpu.memory_space<vmem>>, vector<2x8xf32>
      %16 = arith.maximumf %15, %2 : vector<2x8xf32>
      %c0_14 = arith.constant 0 : index
      %c0_15 = arith.constant 0 : index
      %17 = vector.load %arg7[%c0_14, %c0_15] : memref<2x8xf32, #tpu.memory_space<vmem>>, vector<2x8xf32>
      tpu.vector_store %arg7[%c0_14, %c0_15], %16 {strides = array<i32>} : memref<2x8xf32, #tpu.memory_space<vmem>>, vector<2x8xf32>,
    } else {
    }
    %c0_i32_6 = arith.constant 0 : i32
    %9 = arith.cmpi eq, %arg1, %c0_i32_6 : i32
    %10 = arith.extui %9 : i1 to i32
    %c0_i32_7 = arith.constant 0 : i32
    %11 = arith.cmpi ne, %10, %c0_i32_7 : i32
    scf.if %11 {
      %c0_8 = arith.constant 0 : index
      %c0_9 = arith.constant 0 : index
      %12 = vector.load %arg6[%c0_8, %c0_9] : memref<2x8xf32, #tpu.memory_space<vmem>>, vector<2x8xf32>
      %cst_10 = arith.constant 3.906250e-03 : f32
      %13 = vector.broadcast %cst_10 : f32 to vector<2x8xf32>
      %14 = arith.mulf %12, %13 : vector<2x8xf32>
      %c0_11 = arith.constant 0 : index
      %c0_12 = arith.constant 0 : index
      %15 = vector.load %arg7[%c0_11, %c0_12] : memref<2x8xf32, #tpu.memory_space<vmem>>, vector<2x8xf32>
      %c0_13 = arith.constant 0 : index
      %c0_14 = arith.constant 0 : index
      %16 = vector.load %arg3[%c0_13, %c0_14] : memref<8x2xf32, #tpu.memory_space<vmem>>, vector<8x2xf32>
      %c0_15 = arith.constant 0 : index
      %c0_16 = arith.constant 0 : index
      %17 = vector.load %arg4[%c0_15, %c0_16] : memref<2x8xf32, #tpu.memory_space<vmem>>, vector<2x8xf32>
      %cst_17 = arith.constant dense<0.000000e+00> : vector<2x2xf32>
      %18 = tpu.matmul %14, %16, %cst_17 {dimension_numbers = #tpu.dot_dimension_numbers<[1], [0], [0], [1], [0, 0, 1, 1], [], []>} : vector<2x8xf32>, vector<8x2xf32>, vector<2x2xf32> -> vector<2x2xf32>
      %cst_18 = arith.constant 0.000000e+00 : f32
      %19 = vector.broadcast %cst_18 : f32 to vector<2x2xf32>
      %20 = arith.maximumf %18, %19 : vector<2x2xf32>
      %cst_19 = arith.constant dense<0.000000e+00> : vector<2x2xf32>
      %21 = tpu.matmul %15, %16, %cst_19 {dimension_numbers = #tpu.dot_dimension_numbers<[1], [0], [0], [1], [0, 0, 1, 1], [], []>} : vector<2x8xf32>, vector<8x2xf32>, vector<2x2xf32> -> vector<2x2xf32>
      %cst_20 = arith.constant 0.000000e+00 : f32
      %22 = vector.broadcast %cst_20 : f32 to vector<2x2xf32>
      %23 = arith.maximumf %21, %22 : vector<2x2xf32>
      %24 = arith.addf %20, %23 : vector<2x2xf32>
      %cst_21 = arith.constant dense<0.000000e+00> : vector<2x8xf32>
      %25 = tpu.matmul %24, %17, %cst_21 {dimension_numbers = #tpu.dot_dimension_numbers<[1], [0], [0], [1], [0, 0, 1, 1], [], []>} : vector<2x2xf32>, vector<2x8xf32>, vector<2x8xf32> -> vector<2x8xf32>
      %26 = arith.negf %25 : vector<2x8xf32>
      %27 = math.exp %26 : vector<2x8xf32>
      %cst_22 = arith.constant 1.000000e+00 : f32
      %28 = vector.broadcast %cst_22 : f32 to vector<2x8xf32>
      %29 = arith.addf %28, %27 : vector<2x8xf32>
      %30 = arith.divf %28, %29 : vector<2x8xf32>
      %c0_23 = arith.constant 0 : index
      %c0_24 = arith.constant 0 : index
      %31 = vector.load %arg5[%c0_23, %c0_24] : memref<2x8xf32, #tpu.memory_space<vmem>>, vector<2x8xf32>
      tpu.vector_store %arg5[%c0_23, %c0_24], %30 {strides = array<i32>} : memref<2x8xf32, #tpu.memory_space<vmem>>, vector<2x8xf32>,
    } else {
    }
    return
  }
  func.func @transform_0(%arg0: i32, %arg1: i32) -> (i32, i32, i32) {
    %c0_i32 = arith.constant 0 : i32
    %c0_i32_0 = arith.constant 0 : i32
    return %arg0, %c0_i32, %arg1 : i32, i32, i32
  }
  func.func @transform_1(%arg0: i32, %arg1: i32) -> (i32, i32) {
    %c0_i32 = arith.constant 0 : i32
    %c0_i32_0 = arith.constant 0 : i32
    %c0_i32_1 = arith.constant 0 : i32
    return %c0_i32, %c0_i32_0 : i32, i32
  }
  func.func @transform_2(%arg0: i32, %arg1: i32) -> (i32, i32) {
    %c0_i32 = arith.constant 0 : i32
    %c0_i32_0 = arith.constant 0 : i32
    %c0_i32_1 = arith.constant 0 : i32
    return %c0_i32, %c0_i32_0 : i32, i32
  }
  func.func @transform_3(%arg0: i32, %arg1: i32) -> (i32, i32) {
    %c0_i32 = arith.constant 0 : i32
    %c0_i32_0 = arith.constant 0 : i32
    return %arg0, %c0_i32 : i32, i32
  }
}

</mosaic_0001>

<bundles_post_ra>
// kernel: tpu_custom_call.1
= control target key start
LH: loop header
LB: loop body
LE: loop exit
PB: predicated region body
PF: predicated region fallthrough
CT: control target
= control target key end

     0   :  { %8 = vsyncpa [#allocation5], 0  ;;  %s522_s0 = inlined_call_operand.hbm [shape: f32[2,8,256], index: 0, kind: input, shape index: {}]   ;;  %s523_s1 = inlined_call_operand.vmem [shape: f32[8,2], index: 1, kind: input, shape index: {}]   ;;  %s524_s2 = inlined_call_operand.vmem [shape: f32[2,8], index: 2, kind: input, shape index: {}]   ;;  %s525_s3 = inlined_call_operand.hbm [shape: f32[2,8], index: 3, kind: output, shape index: {}]  }
   0x1   :  { %9 = vsyncpa [#allocation6], 0  ;;  %s460_s12 = smov [#allocation4]   ;;  %s412_s16 = scalar_lea.hbm %s522_s0, 512 }
   0x2   :  { %s15_s13 = sshll.u32 %s460_s12, 4  ;;  %p413_p0 = scmp.ne.s32.totalorder %s522_s0, %s412_s16  ;;  %s16_s13 = int_to_ptr.vmem [resolvable:$true] %s15_s13 }
   0x3   :  { %p416_p1 = scmp.lt.u32.totalorder %s412_s16, %s522_s0 }
   0x5   :  { %p418_p2 = pnand %p416_p1, %p413_p0 }
   0x7   :  { %421 = shalt.err (!%p418_p2)
}
   0x8   :  { %s422_s21 = scalar_lea.vmem %s16_s13, 512  ;;  %p427_p4 = scmp.lt.s32.totalorder %s16_s13, %s16_s13 }
   0x9   :  { %p423_p3 = scmp.ne.s32.totalorder %s16_s13, %s422_s21  ;;  %p428_p5 = scmp.lt.s32.totalorder %s422_s21, %s422_s21 }
   0xb   :  { %p429_p6 = por %p428_p5, %p427_p4 }
   0xd   :  { %p430_p7 = pnand %p429_p6, %p423_p3 }
   0xf   :  { %433 = shalt.err (!%p430_p7)
}
  0x10   :  { %s461_s22 = smov 256   ;;  %s462_s23 = smov 16  }
  0x11   :  { %21 = dma.hbm_to_vmem [thread:$0]  %s522_s0, 512, %s16_s13, [#allocation5], %s461_s22, %s461_s22, %s462_s23  }
  0x12   :  { %456 = dma.done.wait [#allocation5], 512  }
  0x13   :  { %457 = vsyncadd [#allocation5], 4294966784  ;;  %v29_v0 = vld [vmem:[#allocation4] sm:$0xff]  ;;  %v30_v1 = vld [vmem:[#allocation4 + $0x8] sm:$0xff]  ;;  %v463_v9 = vmov 0.0   ;;  %vm464_vm0 = vmmov 0   ;;  %v51_v10 = vlaneseq }
  0x14   :  { %v31_v2 = vld [vmem:[#allocation4 + $0x10] sm:$0xff]  ;;  %v39_v3 = vmax.f32 %v29_v0, %v30_v1  ;;  %v33_v4 = vadd.f32 %v30_v1, %v29_v0  ;;  %v32_v5 = vld [vmem:[#allocation4 + $0x18] sm:$0xff]  ;;  %392 = vmatprep.subr.mxu1 %v463_v9  ;;  %394 = vmatprep.mubr.msk.f32.mxu1 %vm464_vm0, %v463_v9  ;;  %vm61_vm1 = vcmask 1041409   ;;  %vm64_vm2 = vcmask 58368   ;;  %s465_s28 = smov [#allocation7]  }
  0x15   :  { %v42_v6 = vmax.f32 %v31_v2, %v32_v5  ;;  %v36_v7 = vadd.f32 %v32_v5, %v31_v2  ;;  %v123_v8 = vld [vmem:[%s523_s1] sm:$0xff]  ;;  %387 = vmatprep.subr.mxu0 %v463_v9  ;;  %389 = vmatprep.mubr.msk.f32.mxu0 %vm464_vm0, %v463_v9  ;;  %v52_v11 = vand.u32 127, %v51_v10  ;;  %v54_v12 = vshrl.u32 %v51_v10, 7 }
  0x16   :  { %40 = vmax.xlane.f32.xlu1 %v39_v3  ;;  %34 = vadd.xlane.f32.xlu0 %v33_v4  ;;  %vm125_vm3 = vcmask 64512   ;;  %v124_v27 = vld [vmem:[%s524_s2] sm:$0x3]  ;;  %vm279_vm4 = vcmask 1041408   ;;  %vm275_vm5 = vcmask 15360   ;;  %s367_s2 = sshll.u32 %s465_s28, 4  ;;  %s368_s2 = int_to_ptr.vmem [resolvable:$true] %s367_s2 }
  0x17   :  { %393 = vmatpush3.msra.mxu1 %v123_v8  ;;  %388 = vmatpush3.msra.mxu0 %v123_v8  ;;  %v55_v15 = vsub.s32 %v52_v11, %v54_v12  ;;  %s434_s29 = scalar_lea.vmem %s368_s2, 32  ;;  %p439_p9 = scmp.lt.s32.totalorder %s368_s2, %s368_s2 }
  0x18   :  { %397 = vmatprep.subr.mxu0 %v463_v9  ;;  %p435_p8 = scmp.ne.s32.totalorder %s368_s2, %s434_s29  ;;  %p440_p10 = scmp.lt.s32.totalorder %s434_s29, %s434_s29 }
  0x1a   :  { %43 = vmax.xlane.f32.xlu1 %v42_v6  ;;  %37 = vadd.xlane.f32.xlu0 %v36_v7  ;;  %p441_p11 = por %p440_p10, %p439_p9 }
  0x1c   :  { %p442_p12 = pnand %p441_p11, %p435_p8 }
  0xa3   :  { %v41_v13 = vpop.xlane.xlu1 %40  ;;  %v35_v14 = vpop.xlane.xlu0 %34 }
  0xa4   :  { %v71_v18 = vrot.slane %v41_v13, %v55_v15  ;;  %v56_v19 = vrot.slane %v35_v14, %v55_v15 }
  0xa7   :  { %v44_v16 = vpop.xlane.xlu1 %43  ;;  %v38_v17 = vpop.xlane.xlu0 %37 }
  0xa8   :  { %v75_v20 = vrot.slane %v44_v16, %v55_v15  ;;  %v60_v21 = vrot.slane %v38_v17, %v55_v15 }
  0xaa   :  { %v76_v22 = vsel %vm61_vm1, %v75_v20, %v71_v18  ;;  %v62_v23 = vsel %vm61_vm1, %v60_v21, %v56_v19 }
  0xab   :  { %78 = vst.msk [vmem:[#allocation3] sm:$0x3] %vm64_vm2, %v76_v22  ;;  %65 = vst.msk [vmem:[#allocation2] sm:$0x3] %vm64_vm2, %v62_v23 }
  0xb2   :  { %v122_v24 = vld [vmem:[#allocation3] sm:$0x3]  ;;  %v120_v25 = vld [vmem:[#allocation2] sm:$0x3] }
  0xb3   :  { %395 = vmatmul.mubr.msk.f32.vlgmr.msra.gmra.mrb[0].mxu1 %vm125_vm3, %v122_v24  ;;  %v121_v26 = vmul.f32 0.00390625, %v120_v25 }
  0xb5   :  { %390 = vmatmul.mubr.msk.f32.vlgmr.msra.gmra.mrb[0].mxu0 %vm125_vm3, %v121_v26 }
  0xb6   :  { %399 = vmatprep.mubr.msk.f32.mxu0 %vm464_vm0, %v463_v9  ;;  %398 = vmatpush3.msk.msra.mxu0 %vm279_vm4, %v124_v27 }
 0x186   :  { %v269_v28 = vpop.f32.mrb[0].mxu1 }
 0x187   :  { %v396_v29 = vpop.f32.mrb[1].mxu1  ;;  %v273_v31 = vmax.f32 %v269_v28, 0.0 }
 0x188   :  { %v195_v30 = vpop.f32.mrb[0].mxu0 }
 0x189   :  { %v199_v32 = vmax.f32 %v195_v30, 0.0  ;;  %v391_v33 = vpop.f32.mrb[1].mxu0 }
 0x18b   :  { %v274_v34 = vadd.f32 %v273_v31, %v199_v32 }
 0x18d   :  { %400 = vmatmul.mubr.msk.f32.vlgmr.msra.gmra.mrb[2].mxu0 %vm275_vm5, %v274_v34 }
 0x260   :  { %v349_v35 = vpop.f32.mrb[2].mxu0 }
 0x261   :  { %v380_v36 = vmul.f32 -1.442695, %v349_v35  ;;  %v401_v37 = vpop.f32.mrb[3].mxu0 }
 0x263   :  { %408 = vpow2.f32 %v380_v36 }
 0x26d   :  { %v409_v38 = vpop.eup %408 }
 0x26e   :  { %v356_v39 = vadd.f32 1.0, %v409_v38 }
 0x270   :  { %410 = vrcp.f32 %v356_v39 }
 0x27a   :  { %v411_v40 = vpop.eup %410 }
 0x27b   :  { %360 = vst.msk [vmem:[#allocation7] sm:$0x3] %vm64_vm2, %v411_v40 }
 0x27c   :  { %445 = shalt.err (!%p442_p12)
}
 0x27d   :  { %s446_s5 = scalar_lea.hbm %s525_s3, 32 }
 0x27e   :  { %p447_p13 = scmp.ne.s32.totalorder %s525_s3, %s446_s5  ;;  %p450_p0 = scmp.lt.u32.totalorder %s446_s5, %s525_s3 }
 0x280   :  { %p452_p1 = pnand %p450_p0, %p447_p13 }
 0x282   :  { %455 = shalt.err (!%p452_p1)
}
 0x283   :  { %370 = dma.vmem_to_hbm [thread:$0]  %s368_s2, 32, %s525_s3, [#allocation6]  }
 0x284   :  { %458 = dma.done.wait [#allocation6], 32  }
 0x285   :  { %459 = vsyncadd [#allocation6], 4294967264 }
 0x286   :  { %374 = vsyncpa [#allocation5], 1 }
 0x287   :  { %375 = vsyncpa [#allocation6], 1 }

</bundles_post_ra>
